<compile_context>
chip_gen: v5e
topology: v5e:2x2
jax: 0.10.0
libtpu: 0.0.40
codegen_flags: <defaults>
</compile_context>

<pallas_src>
import math

import numpy as np
import jax
import jax.numpy as jnp
from jax import lax
from jax.experimental import pallas as pl
from jax.experimental.pallas import tpu as pltpu


# ----------------------------------------------------------------------------
# Glue: fold a conv layer's kW taps, W padding and W stride into a dense
# (w_in*Cin, w_out*Cout) matrix per kH-tap.
# ----------------------------------------------------------------------------
def _expand_row_weights(w_conv, stride, pad_left, w_in, w_out):
    """w_conv: (Cout, Cin, kH, kW) standard-conv weight (PyTorch Conv2d layout).

    Returns Wexp of shape (kH, w_in*Cin, w_out*Cout) with
      Wexp[kh, win*Cin+ci, wo*Cout+co] = w_conv[co, ci, kh, win + pad_left - stride*wo]
    (zero when that kw index is out of range).
    """
    c_out, c_in, k_h, k_w = w_conv.shape
    win = np.arange(w_in)[:, None]
    wo = np.arange(w_out)[None, :]
    kw = win + pad_left - stride * wo                     # (w_in, w_out), static
    valid = (kw >= 0) & (kw < k_w)
    kw_c = np.clip(kw, 0, k_w - 1)
    wt = jnp.transpose(w_conv, (2, 3, 1, 0))              # (kH, kW, Cin, Cout)
    g = wt[:, kw_c, :, :]                                 # (kH, w_in, w_out, Cin, Cout)
    g = g * jnp.asarray(valid, wt.dtype)[None, :, :, None, None]
    g = jnp.transpose(g, (0, 1, 3, 2, 4))                 # (kH, w_in, Cin, w_out, Cout)
    return g.reshape(k_h, w_in * c_in, w_out * c_out)


# ----------------------------------------------------------------------------
# The fused CAE forward kernel: one batch block per grid step, 4 MXU dots.
# ----------------------------------------------------------------------------
def _cae_kernel(alpha_ref, x_ref, w1_ref, b1_ref, w2_ref, b2_ref,
                w3_ref, b3_ref, w4_ref, b4_ref, low_ref, rec_ref):
    bblk, two_hq, k1 = x_ref.shape
    hq = two_hq // 2
    cd = w1_ref.dtype                       # MXU operand dtype (f32 or bf16)

    a_enc = alpha_ref[0]                    # PReLU slopes from SMEM (runtime params)
    a_dec = alpha_ref[1]

    def mm(a, b):
        return jnp.dot(a, b, preferred_element_type=jnp.float32)

    def prelu(t, a):
        return jnp.where(t > 0, t, a * t)

    def shift_down(t):                      # per-image: row q -> q+1, zero row 0
        z = jnp.zeros_like(t[:, :1])
        return jnp.concatenate([z, t[:, :-1]], axis=1)

    def shift_up(t):                        # per-image: row q -> q-1, zero last row
        z = jnp.zeros_like(t[:, :1])
        return jnp.concatenate([t[:, 1:], z], axis=1)

    # ---- layer 1: Conv2d(1->C1, 3, s=1, p=1) + PReLU -------------------------
    # The wrapper already K-stacked the 3 kH taps and stacked both H phases of
    # the (stride-2-consumed) output along M, so this is a single dot.
    x1 = x_ref[...].reshape(bblk * two_hq, k1)
    y1 = prelu(mm(x1, w1_ref[...]) + b1_ref[...], a_enc).astype(cd)
    y1 = y1.reshape(bblk, 2, hq, y1.shape[-1])
    a_ph = y1[:, 0]                         # y1 rows 2q+1  (== Y1pad rows 2q+2)
    b_ph = y1[:, 1]                         # y1 rows 2q    (== Y1pad rows 2q+1)

    # ---- layer 2: Conv2d(C1->C2, 3, s=2, p=1) --------------------------------
    # y2[ho] needs Y1pad rows 2ho, 2ho+1, 2ho+2 = [shift_down(a), b, a][ho].
    lhs2 = jnp.concatenate([shift_down(a_ph), b_ph, a_ph], axis=-1)
    y2 = mm(lhs2.reshape(bblk * hq, lhs2.shape[-1]), w2_ref[...]) + b2_ref[...]
    low_ref[...] = y2.reshape(bblk, hq, y2.shape[-1])

    # ---- layer 3: ConvTranspose2d(C2->C1, 3, s=1, p=1) + PReLU ---------------
    y2c = y2.astype(cd).reshape(bblk, hq, y2.shape[-1])
    lhs3 = jnp.concatenate([shift_down(y2c), y2c, shift_up(y2c)], axis=-1)
    y3 = prelu(mm(lhs3.reshape(bblk * hq, lhs3.shape[-1]), w3_ref[...])
               + b3_ref[...], a_dec)

    # ---- layer 4: ConvTranspose2d(C1->1, 4, s=2, p=1), sub-pixel -------------
    # All 4 output phases live in the N axis of w4_ref (lane = r*W + 2p + c),
    # so the recon store is one lane-dense (hq, 2W) write per image.
    y3c = y3.astype(cd).reshape(bblk, hq, y3.shape[-1])
    lhs4 = jnp.concatenate([shift_down(y3c), y3c, shift_up(y3c)], axis=-1)
    rec = mm(lhs4.reshape(bblk * hq, lhs4.shape[-1]), w4_ref[...]) + b4_ref[...]
    rec_ref[...] = rec.reshape(bblk, hq, rec.shape[-1])


# ----------------------------------------------------------------------------
# Wrapper: tiny glue prep + the single fused pallas_call.
# ----------------------------------------------------------------------------
def _pick_batch_block(batch, hq):
    """Largest divisor of `batch` with block*hq ~<= 128, keeping >=2 grid steps."""
    target = max(1, 128 // max(hq, 1))
    cap = target if batch < 2 else max(1, min(target, batch // 2))
    bb = 1
    for d in range(1, batch + 1):
        if batch % d == 0 and d <= cap:
            bb = d
    return bb


def cae_forward(params, x_nchw, *, batch_block=None, compute_dtype=jnp.float32):
    """Fused-Pallas forward of CAE(N=[C1, C2]).  x_nchw: (B, 1, H, W), H, W even.
    Returns (low_dim, recon) in NCHW, matching CAE.forward."""
    w1, b1 = params["w1"], params["b1"]       # Conv2d(1,C1,3,1,1):   (C1,1,3,3)
    w2, b2 = params["w2"], params["b2"]       # Conv2d(C1,C2,3,2,1):  (C2,C1,3,3)
    w3, b3 = params["w3"], params["b3"]       # ConvT(C2,C1,3,1,1):   (C2,C1,3,3)
    w4, b4 = params["w4"], params["b4"]       # ConvT(C1,1,4,2,1):    (C1,1,4,4)
    alpha_enc = jnp.asarray(params.get("alpha_enc", 0.25), jnp.float32).reshape(())
    alpha_dec = jnp.asarray(params.get("alpha_dec", 0.25), jnp.float32).reshape(())

    B, cin, H, W = x_nchw.shape
    assert cin == 1 and H % 2 == 0 and W % 2 == 0
    C1, C2 = w1.shape[0], w2.shape[0]
    HQ, WQ = H // 2, W // 2
    f32 = jnp.float32
    cd = compute_dtype

    bb = batch_block if batch_block is not None else _pick_batch_block(B, HQ)
    assert B % bb == 0
    grid = (B // bb,)

    # -- input: K-stacked layer-1 LHS, both H phases stacked along rows -------
    x = x_nchw[:, 0, :, :].astype(f32)                       # (B, H, W)
    xr = x.reshape(B, HQ, 2, W)
    x_even = xr[:, :, 0, :]                                  # x[2q]
    x_odd = xr[:, :, 1, :]                                   # x[2q+1]
    zr = jnp.zeros((B, 1, W), f32)
    x_even_next = jnp.concatenate([x_even[:, 1:], zr], axis=1)   # x[2q+2] or 0
    x_odd_prev = jnp.concatenate([zr, x_odd[:, :-1]], axis=1)    # x[2q-1] or 0
    lhs_e = jnp.concatenate([x_even, x_odd, x_even_next], axis=-1)   # -> y1[2q+1]
    lhs_o = jnp.concatenate([x_odd_prev, x_even, x_odd], axis=-1)    # -> y1[2q]
    x_lhs = jnp.concatenate([lhs_e, lhs_o], axis=1).astype(cd)       # (B, 2HQ, 3W)

    # -- expanded row weights, kH taps stacked along K -------------------------
    w1e = _expand_row_weights(w1.astype(f32), 1, 1, W, W)            # (3, W,     W*C1)
    w2e = _expand_row_weights(w2.astype(f32), 2, 1, W, WQ)           # (3, W*C1,  WQ*C2)
    w3c = jnp.transpose(w3[:, :, ::-1, ::-1], (1, 0, 2, 3))          # ConvT -> conv weight
    w3e = _expand_row_weights(w3c.astype(f32), 1, 1, WQ, WQ)         # (3, WQ*C2, WQ*C1)
    w1s = w1e.reshape(3 * W, W * C1)
    w2s = w2e.reshape(3 * W * C1, WQ * C2)
    w3s = w3e.reshape(3 * WQ * C2, WQ * C1)

    # final ConvTranspose2d(C1->1, 4, s=2, p=1): 4 sub-pixel phases, each a
    # 2x2 stride-1 conv; stack taps along K and phases along N with the output
    # lane order  n = r*W + 2p + c  so the wrapper unshuffle is a pure reshape.
    zero_blk = jnp.zeros((WQ * C1, WQ), f32)
    rows = []
    for r in (0, 1):
        kh_idx = [3, 1] if r == 0 else [2, 0]
        cols = []
        for c in (0, 1):
            kw_idx = [3, 1] if c == 0 else [2, 0]
            wsub = w4[:, :, kh_idx, :][:, :, :, kw_idx]              # (C1, 1, 2, 2)
            wsub = jnp.transpose(wsub, (1, 0, 2, 3)).astype(f32)     # (1, C1, 2, 2)
            wph = _expand_row_weights(wsub, 1, 1 if c == 0 else 0, WQ, WQ)
            blocks = [zero_blk, zero_blk, zero_blk]                  # taps 0..2
            blocks[r] = wph[0]
            blocks[r + 1] = wph[1]
            cols.append(jnp.concatenate(blocks, axis=0))             # (3*WQ*C1, WQ)
        rows.append(jnp.stack(cols, axis=0))                         # (2, 3*WQ*C1, WQ)
    p4 = jnp.stack(rows, axis=0)                                     # (r, c, K, p)
    w4s = jnp.transpose(p4, (2, 0, 3, 1)).reshape(3 * WQ * C1, 2 * W)

    w1s, w2s, w3s, w4s = (t.astype(cd) for t in (w1s, w2s, w3s, w4s))

    # bias rows (kept f32; added on the f32 accumulator)
    b1r = jnp.tile(b1.astype(f32), W).reshape(1, W * C1)
    b2r = jnp.tile(b2.astype(f32), WQ).reshape(1, WQ * C2)
    b3r = jnp.tile(b3.astype(f32), WQ).reshape(1, WQ * C1)
    b4r = jnp.tile(b4.astype(f32), 2 * W).reshape(1, 2 * W)
    alphas = jnp.stack([alpha_enc, alpha_dec])                       # (2,) f32

    def wspec(shape):
        zeros = (0,) * len(shape)
        return pl.BlockSpec(shape, lambda i: zeros)

    low_p, rec_p = pl.pallas_call(
        _cae_kernel,
        out_shape=(
            jax.ShapeDtypeStruct((B, HQ, WQ * C2), f32),             # packed low_dim
            jax.ShapeDtypeStruct((B, HQ, 2 * W), f32),               # lane-dense recon
        ),
        grid_spec=pltpu.PrefetchScalarGridSpec(
            num_scalar_prefetch=0,
            grid=grid,
            in_specs=[
                pl.BlockSpec(memory_space=pltpu.MemorySpace.SMEM),   # PReLU alphas
                pl.BlockSpec((bb, 2 * HQ, 3 * W), lambda i: (i, 0, 0)),
                wspec((3 * W, W * C1)), wspec((1, W * C1)),
                wspec((3 * W * C1, WQ * C2)), wspec((1, WQ * C2)),
                wspec((3 * WQ * C2, WQ * C1)), wspec((1, WQ * C1)),
                wspec((3 * WQ * C1, 2 * W)), wspec((1, 2 * W)),
            ],
            out_specs=[
                pl.BlockSpec((bb, HQ, WQ * C2), lambda i: (i, 0, 0)),
                pl.BlockSpec((bb, HQ, 2 * W), lambda i: (i, 0, 0)),
            ],
        ),
        compiler_params=pltpu.CompilerParams(
            dimension_semantics=("parallel",)),      # batch blocks across TCs on v7x
    )(alphas, x_lhs, w1s, b1r, w2s, b2r, w3s, b3r, w4s, b4r)

    low_dim = low_p.reshape(B, HQ, WQ, C2).transpose(0, 3, 1, 2)     # NCHW
    recon = rec_p.reshape(B, H, W)[:, None, :, :]                    # lane order = pixel order
    return low_dim, recon


# ----------------------------------------------------------------------------
# Parameter construction (PyTorch layouts) + pure-JAX reference.
# ----------------------------------------------------------------------------
def build_cae_params(key, N):
    assert len(N) == 2, "fused kernel implements the 2-stage CAE (N = [c1, c2])"
    C1, C2 = N
    ks = jax.random.split(key, 8)

    def wb(kw_, kb_, shape, cout, fan_in):
        bound = 1.0 / math.sqrt(fan_in)
        w = jax.random.uniform(kw_, shape, jnp.float32, -bound, bound)
        b = jax.random.uniform(kb_, (cout,), jnp.float32, -bound, bound)
        return w, b

    w1, b1 = wb(ks[0], ks[1], (C1, 1, 3, 3), C1, 1 * 9)       # Conv2d(1, C1, 3, 1, 1)
    w2, b2 = wb(ks[2], ks[3], (C2, C1, 3, 3), C2, C1 * 9)     # Conv2d(C1, C2, 3, 2, 1)
    w3, b3 = wb(ks[4], ks[5], (C2, C1, 3, 3), C1, C2 * 9)     # ConvTranspose2d(C2, C1, 3, 1, 1)
    w4, b4 = wb(ks[6], ks[7], (C1, 1, 4, 4), 1, C1 * 16)      # ConvTranspose2d(C1, 1, 4, 2, 1)
    return dict(w1=w1, b1=b1, w2=w2, b2=b2, w3=w3, b3=b3, w4=w4, b4=b4,
                alpha_enc=jnp.float32(0.25), alpha_dec=jnp.float32(0.25))


def cae_reference(params, x):
    alpha_enc = jnp.asarray(params.get("alpha_enc", 0.25), jnp.float32)
    alpha_dec = jnp.asarray(params.get("alpha_dec", 0.25), jnp.float32)

    def conv(x, w, b, s, p):
        y = lax.conv_general_dilated(x, w, (s, s), [(p, p)] * 2,
                                     dimension_numbers=("NCHW", "OIHW", "NCHW"))
        return y + b[None, :, None, None]

    def deconv(x, w, b, s, p, k):
        wc = jnp.transpose(w[:, :, ::-1, ::-1], (1, 0, 2, 3))
        y = lax.conv_general_dilated(x, wc, (1, 1), [(k - 1 - p,) * 2] * 2,
                                     lhs_dilation=(s, s),
                                     dimension_numbers=("NCHW", "OIHW", "NCHW"))
        return y + b[None, :, None, None]

    prelu = lambda t, a: jnp.where(t > 0, t, a * t)
    y = prelu(conv(x, params["w1"], params["b1"], 1, 1), alpha_enc)
    low = conv(y, params["w2"], params["b2"], 2, 1)
    y = prelu(deconv(low, params["w3"], params["b3"], 1, 1, 3), alpha_dec)
    rec = deconv(y, params["w4"], params["b4"], 2, 1, 4)
    return low, rec


if __name__ == "__main__":
    N = [4, 8]                                    # channel schedule of the CAE
    params = build_cae_params(jax.random.PRNGKey(0), N)
    x = jax.random.normal(jax.random.PRNGKey(0), (2, 1, 16, 16), jnp.float32)

    fwd = jax.jit(cae_forward)
    low_dim, recon = fwd(params, x)
    jax.block_until_ready((low_dim, recon))

    assert low_dim.shape == (2, N[-1], 8, 8), low_dim.shape
    assert recon.shape == (2, 1, 16, 16), recon.shape

    # sanity check against a pure-JAX reference
    low_r, rec_r = cae_reference(params, x)
    assert jnp.allclose(low_dim, low_r, rtol=1e-4, atol=1e-4), \
        float(jnp.abs(low_dim - low_r).max())
    assert jnp.allclose(recon, rec_r, rtol=1e-4, atol=1e-4), \
        float(jnp.abs(recon - rec_r).max())

    print("KERNEL_OK")
</pallas_src>

<mosaic_0001>
module attributes {stable_mosaic.version = 11 : i64} {
  func.func @_cae_kernel(%arg0: i32, %arg1: memref<2xf32, #tpu.memory_space<smem>>, %arg2: memref<1x16x48xf32, #tpu.memory_space<vmem>>, %arg3: memref<48x64xf32, #tpu.memory_space<vmem>>, %arg4: memref<1x64xf32, #tpu.memory_space<vmem>>, %arg5: memref<192x64xf32, #tpu.memory_space<vmem>>, %arg6: memref<1x64xf32, #tpu.memory_space<vmem>>, %arg7: memref<192x32xf32, #tpu.memory_space<vmem>>, %arg8: memref<1x32xf32, #tpu.memory_space<vmem>>, %arg9: memref<96x32xf32, #tpu.memory_space<vmem>>, %arg10: memref<1x32xf32, #tpu.memory_space<vmem>>, %arg11: memref<1x8x64xf32, #tpu.memory_space<vmem>>, %arg12: memref<1x8x32xf32, #tpu.memory_space<vmem>>) attributes {dimension_semantics = [#tpu.dimension_semantics<parallel>], iteration_bounds = array<i64: 2>, scalar_prefetch = 0 : i64, scratch_operands = 0 : i64, tpu.core_type = #tpu.core_type<tc>, window_params = [{transform_indices = @transform_0, window_bounds = array<i64: 2>}, {transform_indices = @transform_1, window_bounds = array<i64: 1, 16, 48>}, {pipeline_mode = #tpu.pipeline_mode<synchronous>, transform_indices = @transform_2, window_bounds = array<i64: 48, 64>}, {pipeline_mode = #tpu.pipeline_mode<synchronous>, transform_indices = @transform_3, window_bounds = array<i64: 1, 64>}, {pipeline_mode = #tpu.pipeline_mode<synchronous>, transform_indices = @transform_4, window_bounds = array<i64: 192, 64>}, {pipeline_mode = #tpu.pipeline_mode<synchronous>, transform_indices = @transform_5, window_bounds = array<i64: 1, 64>}, {pipeline_mode = #tpu.pipeline_mode<synchronous>, transform_indices = @transform_6, window_bounds = array<i64: 192, 32>}, {pipeline_mode = #tpu.pipeline_mode<synchronous>, transform_indices = @transform_7, window_bounds = array<i64: 1, 32>}, {pipeline_mode = #tpu.pipeline_mode<synchronous>, transform_indices = @transform_8, window_bounds = array<i64: 96, 32>}, {pipeline_mode = #tpu.pipeline_mode<synchronous>, transform_indices = @transform_9, window_bounds = array<i64: 1, 32>}, {transform_indices = @transform_10, window_bounds = array<i64: 1, 8, 64>}, {transform_indices = @transform_11, window_bounds = array<i64: 1, 8, 32>}]} {
    %c0 = arith.constant 0 : index
    %0 = memref.load %arg1[%c0] : memref<2xf32, #tpu.memory_space<smem>>
    %c1 = arith.constant 1 : index
    %1 = memref.load %arg1[%c1] : memref<2xf32, #tpu.memory_space<smem>>
    %c0_0 = arith.constant 0 : index
    %c0_1 = arith.constant 0 : index
    %c0_2 = arith.constant 0 : index
    %2 = vector.load %arg2[%c0_0, %c0_1, %c0_2] : memref<1x16x48xf32, #tpu.memory_space<vmem>>, vector<1x16x48xf32>
    %3 = vector.shape_cast %2 : vector<1x16x48xf32> to vector<16x48xf32>
    %c0_3 = arith.constant 0 : index
    %c0_4 = arith.constant 0 : index
    %4 = vector.load %arg3[%c0_3, %c0_4] : memref<48x64xf32, #tpu.memory_space<vmem>>, vector<48x64xf32>
    %cst = arith.constant dense<0.000000e+00> : vector<16x64xf32>
    %5 = tpu.matmul %3, %4, %cst {dimension_numbers = #tpu.dot_dimension_numbers<[1], [0], [0], [1], [0, 0, 1, 1], [], []>} : vector<16x48xf32>, vector<48x64xf32>, vector<16x64xf32> -> vector<16x64xf32>
    %c0_5 = arith.constant 0 : index
    %c0_6 = arith.constant 0 : index
    %6 = vector.load %arg4[%c0_5, %c0_6] : memref<1x64xf32, #tpu.memory_space<vmem>>, vector<1x64xf32>
    %7 = vector.broadcast %6 : vector<1x64xf32> to vector<16x64xf32>
    %8 = arith.addf %5, %7 : vector<16x64xf32>
    %cst_7 = arith.constant 0.000000e+00 : f32
    %9 = vector.broadcast %cst_7 : f32 to vector<16x64xf32>
    %10 = arith.cmpf ogt, %8, %9 : vector<16x64xf32>
    %11 = vector.broadcast %0 : f32 to vector<16x64xf32>
    %12 = arith.mulf %11, %8 : vector<16x64xf32>
    %13 = arith.select %10, %8, %12 : vector<16x64xi1>, vector<16x64xf32>
    %14 = vector.shape_cast %13 : vector<16x64xf32> to vector<1x2x8x64xf32>
    %15 = vector.extract_strided_slice %14 {offsets = [0, 0, 0, 0], sizes = [1, 1, 8, 64], strides = [1, 1, 1, 1]} : vector<1x2x8x64xf32> to vector<1x1x8x64xf32>
    %16 = vector.shape_cast %15 : vector<1x1x8x64xf32> to vector<1x8x64xf32>
    %17 = vector.extract_strided_slice %14 {offsets = [0, 1, 0, 0], sizes = [1, 1, 8, 64], strides = [1, 1, 1, 1]} : vector<1x2x8x64xf32> to vector<1x1x8x64xf32>
    %18 = vector.shape_cast %17 : vector<1x1x8x64xf32> to vector<1x8x64xf32>
    %cst_8 = arith.constant 0.000000e+00 : f32
    %19 = vector.broadcast %cst_8 : f32 to vector<1x1x64xf32>
    %20 = vector.extract_strided_slice %16 {offsets = [0, 0, 0], sizes = [1, 7, 64], strides = [1, 1, 1]} : vector<1x8x64xf32> to vector<1x7x64xf32>
    %21 = tpu.concatenate %19, %20 in 1 : vector<1x1x64xf32>, vector<1x7x64xf32> -> vector<1x8x64xf32>
    %22 = tpu.concatenate %21, %18, %16 in 2 : vector<1x8x64xf32>, vector<1x8x64xf32>, vector<1x8x64xf32> -> vector<1x8x192xf32>
    %23 = vector.shape_cast %22 : vector<1x8x192xf32> to vector<8x192xf32>
    %c0_9 = arith.constant 0 : index
    %c0_10 = arith.constant 0 : index
    %24 = vector.load %arg5[%c0_9, %c0_10] : memref<192x64xf32, #tpu.memory_space<vmem>>, vector<192x64xf32>
    %cst_11 = arith.constant dense<0.000000e+00> : vector<8x64xf32>
    %25 = tpu.matmul %23, %24, %cst_11 {dimension_numbers = #tpu.dot_dimension_numbers<[1], [0], [0], [1], [0, 0, 1, 1], [], []>} : vector<8x192xf32>, vector<192x64xf32>, vector<8x64xf32> -> vector<8x64xf32>
    %c0_12 = arith.constant 0 : index
    %c0_13 = arith.constant 0 : index
    %26 = vector.load %arg6[%c0_12, %c0_13] : memref<1x64xf32, #tpu.memory_space<vmem>>, vector<1x64xf32>
    %27 = vector.broadcast %26 : vector<1x64xf32> to vector<8x64xf32>
    %28 = arith.addf %25, %27 : vector<8x64xf32>
    %29 = vector.shape_cast %28 : vector<8x64xf32> to vector<1x8x64xf32>
    %c0_14 = arith.constant 0 : index
    %c0_15 = arith.constant 0 : index
    %c0_16 = arith.constant 0 : index
    %30 = vector.load %arg11[%c0_14, %c0_15, %c0_16] : memref<1x8x64xf32, #tpu.memory_space<vmem>>, vector<1x8x64xf32>
    tpu.vector_store %arg11[%c0_14, %c0_15, %c0_16], %29 {strides = array<i32>} : memref<1x8x64xf32, #tpu.memory_space<vmem>>, vector<1x8x64xf32>,
    %31 = vector.shape_cast %28 : vector<8x64xf32> to vector<1x8x64xf32>
    %cst_17 = arith.constant 0.000000e+00 : f32
    %32 = vector.broadcast %cst_17 : f32 to vector<1x1x64xf32>
    %33 = vector.extract_strided_slice %31 {offsets = [0, 0, 0], sizes = [1, 7, 64], strides = [1, 1, 1]} : vector<1x8x64xf32> to vector<1x7x64xf32>
    %34 = tpu.concatenate %32, %33 in 1 : vector<1x1x64xf32>, vector<1x7x64xf32> -> vector<1x8x64xf32>
    %cst_18 = arith.constant 0.000000e+00 : f32
    %35 = vector.broadcast %cst_18 : f32 to vector<1x1x64xf32>
    %36 = vector.extract_strided_slice %31 {offsets = [0, 1, 0], sizes = [1, 7, 64], strides = [1, 1, 1]} : vector<1x8x64xf32> to vector<1x7x64xf32>
    %37 = tpu.concatenate %36, %35 in 1 : vector<1x7x64xf32>, vector<1x1x64xf32> -> vector<1x8x64xf32>
    %38 = tpu.concatenate %34, %31, %37 in 2 : vector<1x8x64xf32>, vector<1x8x64xf32>, vector<1x8x64xf32> -> vector<1x8x192xf32>
    %39 = vector.shape_cast %38 : vector<1x8x192xf32> to vector<8x192xf32>
    %c0_19 = arith.constant 0 : index
    %c0_20 = arith.constant 0 : index
    %40 = vector.load %arg7[%c0_19, %c0_20] : memref<192x32xf32, #tpu.memory_space<vmem>>, vector<192x32xf32>
    %cst_21 = arith.constant dense<0.000000e+00> : vector<8x32xf32>
    %41 = tpu.matmul %39, %40, %cst_21 {dimension_numbers = #tpu.dot_dimension_numbers<[1], [0], [0], [1], [0, 0, 1, 1], [], []>} : vector<8x192xf32>, vector<192x32xf32>, vector<8x32xf32> -> vector<8x32xf32>
    %c0_22 = arith.constant 0 : index
    %c0_23 = arith.constant 0 : index
    %42 = vector.load %arg8[%c0_22, %c0_23] : memref<1x32xf32, #tpu.memory_space<vmem>>, vector<1x32xf32>
    %43 = vector.broadcast %42 : vector<1x32xf32> to vector<8x32xf32>
    %44 = arith.addf %41, %43 : vector<8x32xf32>
    %cst_24 = arith.constant 0.000000e+00 : f32
    %45 = vector.broadcast %cst_24 : f32 to vector<8x32xf32>
    %46 = arith.cmpf ogt, %44, %45 : vector<8x32xf32>
    %47 = vector.broadcast %1 : f32 to vector<8x32xf32>
    %48 = arith.mulf %47, %44 : vector<8x32xf32>
    %49 = arith.select %46, %44, %48 : vector<8x32xi1>, vector<8x32xf32>
    %50 = vector.shape_cast %49 : vector<8x32xf32> to vector<1x8x32xf32>
    %cst_25 = arith.constant 0.000000e+00 : f32
    %51 = vector.broadcast %cst_25 : f32 to vector<1x1x32xf32>
    %52 = vector.extract_strided_slice %50 {offsets = [0, 0, 0], sizes = [1, 7, 32], strides = [1, 1, 1]} : vector<1x8x32xf32> to vector<1x7x32xf32>
    %53 = tpu.concatenate %51, %52 in 1 : vector<1x1x32xf32>, vector<1x7x32xf32> -> vector<1x8x32xf32>
    %cst_26 = arith.constant 0.000000e+00 : f32
    %54 = vector.broadcast %cst_26 : f32 to vector<1x1x32xf32>
    %55 = vector.extract_strided_slice %50 {offsets = [0, 1, 0], sizes = [1, 7, 32], strides = [1, 1, 1]} : vector<1x8x32xf32> to vector<1x7x32xf32>
    %56 = tpu.concatenate %55, %54 in 1 : vector<1x7x32xf32>, vector<1x1x32xf32> -> vector<1x8x32xf32>
    %57 = tpu.concatenate %53, %50, %56 in 2 : vector<1x8x32xf32>, vector<1x8x32xf32>, vector<1x8x32xf32> -> vector<1x8x96xf32>
    %58 = vector.shape_cast %57 : vector<1x8x96xf32> to vector<8x96xf32>
    %c0_27 = arith.constant 0 : index
    %c0_28 = arith.constant 0 : index
    %59 = vector.load %arg9[%c0_27, %c0_28] : memref<96x32xf32, #tpu.memory_space<vmem>>, vector<96x32xf32>
    %cst_29 = arith.constant dense<0.000000e+00> : vector<8x32xf32>
    %60 = tpu.matmul %58, %59, %cst_29 {dimension_numbers = #tpu.dot_dimension_numbers<[1], [0], [0], [1], [0, 0, 1, 1], [], []>} : vector<8x96xf32>, vector<96x32xf32>, vector<8x32xf32> -> vector<8x32xf32>
    %c0_30 = arith.constant 0 : index
    %c0_31 = arith.constant 0 : index
    %61 = vector.load %arg10[%c0_30, %c0_31] : memref<1x32xf32, #tpu.memory_space<vmem>>, vector<1x32xf32>
    %62 = vector.broadcast %61 : vector<1x32xf32> to vector<8x32xf32>
    %63 = arith.addf %60, %62 : vector<8x32xf32>
    %64 = vector.shape_cast %63 : vector<8x32xf32> to vector<1x8x32xf32>
    %c0_32 = arith.constant 0 : index
    %c0_33 = arith.constant 0 : index
    %c0_34 = arith.constant 0 : index
    %65 = vector.load %arg12[%c0_32, %c0_33, %c0_34] : memref<1x8x32xf32, #tpu.memory_space<vmem>>, vector<1x8x32xf32>
    tpu.vector_store %arg12[%c0_32, %c0_33, %c0_34], %64 {strides = array<i32>} : memref<1x8x32xf32, #tpu.memory_space<vmem>>, vector<1x8x32xf32>,
    return
  }
  func.func @transform_0(%arg0: i32) -> i32 {
    %c0_i32 = arith.constant 0 : i32
    %c0_i32_0 = arith.constant 0 : i32
    return %c0_i32 : i32
  }
  func.func @transform_1(%arg0: i32) -> (i32, i32, i32) {
    %c0_i32 = arith.constant 0 : i32
    %c0_i32_0 = arith.constant 0 : i32
    %c0_i32_1 = arith.constant 0 : i32
    return %arg0, %c0_i32, %c0_i32_0 : i32, i32, i32
  }
  func.func @transform_2(%arg0: i32) -> (i32, i32) {
    %c0_i32 = arith.constant 0 : i32
    %c0_i32_0 = arith.constant 0 : i32
    %c0_i32_1 = arith.constant 0 : i32
    return %c0_i32, %c0_i32_0 : i32, i32
  }
  func.func @transform_3(%arg0: i32) -> (i32, i32) {
    %c0_i32 = arith.constant 0 : i32
    %c0_i32_0 = arith.constant 0 : i32
    %c0_i32_1 = arith.constant 0 : i32
    return %c0_i32, %c0_i32_0 : i32, i32
  }
  func.func @transform_4(%arg0: i32) -> (i32, i32) {
    %c0_i32 = arith.constant 0 : i32
    %c0_i32_0 = arith.constant 0 : i32
    %c0_i32_1 = arith.constant 0 : i32
    return %c0_i32, %c0_i32_0 : i32, i32
  }
  func.func @transform_5(%arg0: i32) -> (i32, i32) {
    %c0_i32 = arith.constant 0 : i32
    %c0_i32_0 = arith.constant 0 : i32
    %c0_i32_1 = arith.constant 0 : i32
    return %c0_i32, %c0_i32_0 : i32, i32
  }
  func.func @transform_6(%arg0: i32) -> (i32, i32) {
    %c0_i32 = arith.constant 0 : i32
    %c0_i32_0 = arith.constant 0 : i32
    %c0_i32_1 = arith.constant 0 : i32
    return %c0_i32, %c0_i32_0 : i32, i32
  }
  func.func @transform_7(%arg0: i32) -> (i32, i32) {
    %c0_i32 = arith.constant 0 : i32
    %c0_i32_0 = arith.constant 0 : i32
    %c0_i32_1 = arith.constant 0 : i32
    return %c0_i32, %c0_i32_0 : i32, i32
  }
  func.func @transform_8(%arg0: i32) -> (i32, i32) {
    %c0_i32 = arith.constant 0 : i32
    %c0_i32_0 = arith.constant 0 : i32
    %c0_i32_1 = arith.constant 0 : i32
    return %c0_i32, %c0_i32_0 : i32, i32
  }
  func.func @transform_9(%arg0: i32) -> (i32, i32) {
    %c0_i32 = arith.constant 0 : i32
    %c0_i32_0 = arith.constant 0 : i32
    %c0_i32_1 = arith.constant 0 : i32
    return %c0_i32, %c0_i32_0 : i32, i32
  }
  func.func @transform_10(%arg0: i32) -> (i32, i32, i32) {
    %c0_i32 = arith.constant 0 : i32
    %c0_i32_0 = arith.constant 0 : i32
    %c0_i32_1 = arith.constant 0 : i32
    return %arg0, %c0_i32, %c0_i32_0 : i32, i32, i32
  }
  func.func @transform_11(%arg0: i32) -> (i32, i32, i32) {
    %c0_i32 = arith.constant 0 : i32
    %c0_i32_0 = arith.constant 0 : i32
    %c0_i32_1 = arith.constant 0 : i32
    return %arg0, %c0_i32, %c0_i32_0 : i32, i32, i32
  }
}

</mosaic_0001>

<bundles_post_ra>
// kernel: tile.23
= control target key start
LH: loop header
LB: loop body
LE: loop exit
PB: predicated region body
PF: predicated region fallthrough
CT: control target
= control target key end

     0   :  { %s28_s0 = inlined_call_operand.vmem [shape: f32[4], index: 0, kind: input, shape index: {}]   ;;  %s29_s1 = inlined_call_operand.vmem [shape: f32[16,4], index: 1, kind: output, shape index: {}]  }
   0x1   :  { %v4_v0 = vld [vmem:[%s28_s0] ss:$0 sm:$0xff] }
   0x2   :  { %5 = vst [vmem:[%s29_s1] sm:$0xff] %v4_v0 }
   0x3   :  { %8 = vst [vmem:[%s29_s1 + $0x8] sm:$0xff] %v4_v0 }

// kernel: tile.24
= control target key start
LH: loop header
LB: loop body
LE: loop exit
PB: predicated region body
PF: predicated region fallthrough
CT: control target
= control target key end

     0   :  { %s131_s10 = smov 60   ;;  %s132_s11 = smov 52   ;;  %vm3_vm0 = vcmask 31744   ;;  %vm9_vm1 = vcmask 523744   ;;  %vm15_vm2 = vcmask 490944   ;;  %vm21_vm3 = vcmask 458144   ;;  %s207_s0 = inlined_call_operand.vmem [shape: f32[16,4], index: 0, kind: input, shape index: {}]   ;;  %s208_s1 = inlined_call_operand.vmem [shape: f32[1,64], index: 1, kind: output, shape index: {}]  }
   0x1   :  { %v101_v0 = vld [vmem:[%s207_s0 + $0xf] sm:$0x1]   ;;  %v103_v1 = vld [vmem:[%s207_s0 + $0xd] sm:$0x1]   ;;  %v105_v2 = vld [vmem:[%s207_s0 + $0xb] sm:$0x1]  }
   0x2   :  { %7 = vrot.lane.b32.xlu0 %v101_v0, %s131_s10  ;;  %19 = vrot.lane.b32.xlu1 %v103_v1, %s132_s11  ;;  %s133_s14 = smov 44   ;;  %v102_v3 = vld [vmem:[%s207_s0 + $0xe] sm:$0x1]   ;;  %v104_v4 = vld [vmem:[%s207_s0 + $0xc] sm:$0x1]   ;;  %s134_s19 = smov 56  }
   0x3   :  { %31 = vrot.lane.b32.xlu2 %v105_v2, %s133_s14  ;;  %s135_s20 = smov 48   ;;  %v106_v5 = vld [vmem:[%s207_s0 + $0xa] sm:$0x1]   ;;  %s136_s23 = smov 40   ;;  %v107_v6 = vld [vmem:[%s207_s0 + $0x9] sm:$0x1]  }
   0x4   :  { %v108_v7 = vld [vmem:[%s207_s0 + $0x8] sm:$0x1]   ;;  %s137_s28 = smov 36   ;;  %s138_s29 = smov 32   ;;  %v109_v8 = vld [vmem:[%s207_s0 + $0x7] sm:$0x1]  }
   0x5   :  { %s139_s3 = smov 28   ;;  %v110_v9 = vld [vmem:[%s207_s0 + $0x6] sm:$0x1]   ;;  %v111_v10 = vld [vmem:[%s207_s0 + $0x5] sm:$0x1]   ;;  %s140_s8 = smov 24  }
   0x6   :  { %s141_s9 = smov 20   ;;  %v112_v11 = vld [vmem:[%s207_s0 + $0x4] sm:$0x1]   ;;  %s142_s12 = smov 16   ;;  %v113_v12 = vld [vmem:[%s207_s0 + $0x3] sm:$0x1]  }
   0x7   :  { %v114_v13 = vld [vmem:[%s207_s0 + $0x2] sm:$0x1]   ;;  %s143_s17 = smov 12   ;;  %s144_s18 = smov 8   ;;  %v115_v14 = vld [vmem:[%s207_s0 + $0x1] sm:$0x1]  }
   0x8   :  { %s145_s21 = smov 4   ;;  %v2_v15 = vld [vmem:[%s207_s0] sm:$0x1]   ;;  %vm27_vm4 = vcmask 425344   ;;  %vm33_vm5 = vcmask 392544   ;;  %vm39_vm6 = vcmask 359744  }
   0x9   :  { %4 = vst.msk [vmem:[#allocation0] sm:$0x1] %vm3_vm0, %v2_v15   ;;  %vm45_vm7 = vcmask 326944   ;;  %vm51_vm8 = vcmask 294144   ;;  %vm57_vm9 = vcmask 261344   ;;  %vm63_vm10 = vcmask 228544  }
   0xa   :  { %13 = vrot.lane.b32.xlu0 %v102_v3, %s134_s19  ;;  %25 = vrot.lane.b32.xlu1 %v104_v4, %s135_s20  ;;  %vm69_vm11 = vcmask 195744   ;;  %vm75_vm12 = vcmask 162944   ;;  %vm81_vm13 = vcmask 130144   ;;  %vm87_vm14 = vcmask 97344  }
   0xb   :  { %37 = vrot.lane.b32.xlu2 %v106_v5, %s136_s23  ;;  %vm93_vm15 = vcmask 64544  }
  0x12   :  { %43 = vrot.lane.b32.xlu0 %v107_v6, %s137_s28  ;;  %49 = vrot.lane.b32.xlu1 %v108_v7, %s138_s29 }
  0x13   :  { %55 = vrot.lane.b32.xlu2 %v109_v8, %s139_s3 }
  0x1a   :  { %61 = vrot.lane.b32.xlu0 %v110_v9, %s140_s8  ;;  %67 = vrot.lane.b32.xlu1 %v111_v10, %s141_s9 }
  0x1b   :  { %73 = vrot.lane.b32.xlu2 %v112_v11, %s142_s12 }
  0x22   :  { %79 = vrot.lane.b32.xlu0 %v113_v12, %s143_s17  ;;  %85 = vrot.lane.b32.xlu1 %v114_v13, %s144_s18 }
  0x23   :  { %91 = vrot.lane.b32.xlu2 %v115_v14, %s145_s21 }
  0x5d   :  { %v32_v16 = vpop.permute.xlu2 %31  }
  0x65   :  { %v38_v17 = vpop.permute.xlu2 %37  }
  0x6d   :  { %v56_v18 = vpop.permute.xlu2 %55  }
  0x74   :  { %v8_v19 = vpop.permute.xlu0 %7   ;;  %v20_v20 = vpop.permute.xlu1 %19  }
  0x75   :  { %10 = vst.msk [vmem:[#allocation0] sm:$0x1] %vm9_vm1, %v8_v19   ;;  %v74_v21 = vpop.permute.xlu2 %73  }
  0x7c   :  { %v14_v22 = vpop.permute.xlu0 %13   ;;  %v26_v23 = vpop.permute.xlu1 %25  }
  0x7d   :  { %16 = vst.msk [vmem:[#allocation0] sm:$0x1] %vm15_vm2, %v14_v22   ;;  %v92_v24 = vpop.permute.xlu2 %91  }
  0x7e   :  { %22 = vst.msk [vmem:[#allocation0] sm:$0x1] %vm21_vm3, %v20_v20  }
  0x7f   :  { %28 = vst.msk [vmem:[#allocation0] sm:$0x1] %vm27_vm4, %v26_v23  }
  0x80   :  { %34 = vst.msk [vmem:[#allocation0] sm:$0x1] %vm33_vm5, %v32_v16  }
  0x81   :  { %40 = vst.msk [vmem:[#allocation0] sm:$0x1] %vm39_vm6, %v38_v17  }
  0x84   :  { %v44_v25 = vpop.permute.xlu0 %43   ;;  %v50_v26 = vpop.permute.xlu1 %49  }
  0x85   :  { %46 = vst.msk [vmem:[#allocation0] sm:$0x1] %vm45_vm7, %v44_v25  }
  0x86   :  { %52 = vst.msk [vmem:[#allocation0] sm:$0x1] %vm51_vm8, %v50_v26  }
  0x87   :  { %58 = vst.msk [vmem:[#allocation0] sm:$0x1] %vm57_vm9, %v56_v18  }
  0x8c   :  { %v62_v27 = vpop.permute.xlu0 %61   ;;  %v68_v28 = vpop.permute.xlu1 %67  }
  0x8d   :  { %64 = vst.msk [vmem:[#allocation0] sm:$0x1] %vm63_vm10, %v62_v27  }
  0x8e   :  { %70 = vst.msk [vmem:[#allocation0] sm:$0x1] %vm69_vm11, %v68_v28  }
  0x8f   :  { %76 = vst.msk [vmem:[#allocation0] sm:$0x1] %vm75_vm12, %v74_v21  }
  0x94   :  { %v80_v29 = vpop.permute.xlu0 %79   ;;  %v86_v30 = vpop.permute.xlu1 %85  }
  0x95   :  { %82 = vst.msk [vmem:[#allocation0] sm:$0x1] %vm81_vm13, %v80_v29  }
  0x96   :  { %88 = vst.msk [vmem:[#allocation0] sm:$0x1] %vm87_vm14, %v86_v30  }
  0x97   :  { %94 = vst.msk [vmem:[#allocation0] sm:$0x1] %vm93_vm15, %v92_v24  }
  0x9e   :  { %v97_v31 = vld [vmem:[#allocation0] sm:$0x1] }
  0x9f   :  { %100 = vst [vmem:[%s208_s1] sm:$0x1] %v97_v31 }

// kernel: tile.28
= control target key start
LH: loop header
LB: loop body
LE: loop exit
PB: predicated region body
PF: predicated region fallthrough
CT: control target
= control target key end

     0   :  { %s22_s0 = inlined_call_operand.vmem [shape: f32[8], index: 0, kind: input, shape index: {}]   ;;  %s23_s1 = inlined_call_operand.vmem [shape: f32[8,8], index: 1, kind: output, shape index: {}]  }
   0x1   :  { %v4_v0 = vld [vmem:[%s22_s0] ss:$0 sm:$0xff] }
   0x2   :  { %5 = vst [vmem:[%s23_s1] sm:$0xff] %v4_v0 }

// kernel: tile.29
= control target key start
LH: loop header
LB: loop body
LE: loop exit
PB: predicated region body
PF: predicated region fallthrough
CT: control target
= control target key end

     0   :  { %s67_s10 = smov 56   ;;  %s68_s11 = smov 40   ;;  %vm3_vm0 = vcmask 64512   ;;  %vm9_vm1 = vcmask 523712   ;;  %vm15_vm2 = vcmask 458112   ;;  %vm21_vm3 = vcmask 392512   ;;  %s111_s0 = inlined_call_operand.vmem [shape: f32[8,8], index: 0, kind: input, shape index: {}]   ;;  %s112_s1 = inlined_call_operand.vmem [shape: f32[1,64], index: 1, kind: output, shape index: {}]  }
   0x1   :  { %v53_v0 = vld [vmem:[%s111_s0 + $0x7] sm:$0x1]   ;;  %v55_v1 = vld [vmem:[%s111_s0 + $0x5] sm:$0x1]   ;;  %v57_v2 = vld [vmem:[%s111_s0 + $0x3] sm:$0x1]  }
   0x2   :  { %7 = vrot.lane.b32.xlu0 %v53_v0, %s67_s10  ;;  %19 = vrot.lane.b32.xlu1 %v55_v1, %s68_s11  ;;  %s69_s14 = smov 24   ;;  %v54_v3 = vld [vmem:[%s111_s0 + $0x6] sm:$0x1]   ;;  %v56_v4 = vld [vmem:[%s111_s0 + $0x4] sm:$0x1]   ;;  %s70_s21 = smov 48  }
   0x3   :  { %31 = vrot.lane.b32.xlu2 %v57_v2, %s69_s14  ;;  %v58_v5 = vld [vmem:[%s111_s0 + $0x2] sm:$0x1]   ;;  %s71_s22 = smov 32   ;;  %s72_s23 = smov 16   ;;  %v59_v6 = vld [vmem:[%s111_s0 + $0x1] sm:$0x1]  }
   0x4   :  { %s73_s26 = smov 8   ;;  %v2_v7 = vld [vmem:[%s111_s0] sm:$0x1]   ;;  %vm27_vm4 = vcmask 326912   ;;  %vm33_vm5 = vcmask 261312   ;;  %vm39_vm6 = vcmask 195712  }
   0x5   :  { %4 = vst.msk [vmem:[#allocation0] sm:$0x1] %vm3_vm0, %v2_v7   ;;  %vm45_vm7 = vcmask 130112  }
   0xa   :  { %13 = vrot.lane.b32.xlu0 %v54_v3, %s70_s21  ;;  %25 = vrot.lane.b32.xlu1 %v56_v4, %s71_s22 }
   0xb   :  { %37 = vrot.lane.b32.xlu2 %v58_v5, %s72_s23 }
  0x12   :  { %43 = vrot.lane.b32.xlu0 %v59_v6, %s73_s26 }
  0x5d   :  { %v32_v8 = vpop.permute.xlu2 %31  }
  0x65   :  { %v38_v9 = vpop.permute.xlu2 %37  }
  0x74   :  { %v8_v10 = vpop.permute.xlu0 %7   ;;  %v20_v11 = vpop.permute.xlu1 %19  }
  0x75   :  { %10 = vst.msk [vmem:[#allocation0] sm:$0x1] %vm9_vm1, %v8_v10  }
  0x7c   :  { %v14_v12 = vpop.permute.xlu0 %13   ;;  %v26_v13 = vpop.permute.xlu1 %25  }
  0x7d   :  { %16 = vst.msk [vmem:[#allocation0] sm:$0x1] %vm15_vm2, %v14_v12  }
  0x7e   :  { %22 = vst.msk [vmem:[#allocation0] sm:$0x1] %vm21_vm3, %v20_v11  }
  0x7f   :  { %28 = vst.msk [vmem:[#allocation0] sm:$0x1] %vm27_vm4, %v26_v13  }
  0x80   :  { %34 = vst.msk [vmem:[#allocation0] sm:$0x1] %vm33_vm5, %v32_v8  }
  0x81   :  { %40 = vst.msk [vmem:[#allocation0] sm:$0x1] %vm39_vm6, %v38_v9  }
  0x84   :  { %v44_v14 = vpop.permute.xlu0 %43  }
  0x85   :  { %46 = vst.msk [vmem:[#allocation0] sm:$0x1] %vm45_vm7, %v44_v14  }
  0x8c   :  { %v49_v15 = vld [vmem:[#allocation0] sm:$0x1] }
  0x8d   :  { %52 = vst [vmem:[%s112_s1] sm:$0x1] %v49_v15 }

// kernel: tile.33
= control target key start
LH: loop header
LB: loop body
LE: loop exit
PB: predicated region body
PF: predicated region fallthrough
CT: control target
= control target key end

     0   :  { %s22_s0 = inlined_call_operand.vmem [shape: f32[4], index: 0, kind: input, shape index: {}]   ;;  %s23_s1 = inlined_call_operand.vmem [shape: f32[8,4], index: 1, kind: output, shape index: {}]  }
   0x1   :  { %v4_v0 = vld [vmem:[%s22_s0] ss:$0 sm:$0xff] }
   0x2   :  { %5 = vst [vmem:[%s23_s1] sm:$0xff] %v4_v0 }

// kernel: tile.34
= control target key start
LH: loop header
LB: loop body
LE: loop exit
PB: predicated region body
PF: predicated region fallthrough
CT: control target
= control target key end

     0   :  { %s67_s10 = smov 28   ;;  %s68_s11 = smov 20   ;;  %vm3_vm0 = vcmask 31744   ;;  %vm9_vm1 = vcmask 261344   ;;  %vm15_vm2 = vcmask 228544   ;;  %vm21_vm3 = vcmask 195744   ;;  %s111_s0 = inlined_call_operand.vmem [shape: f32[8,4], index: 0, kind: input, shape index: {}]   ;;  %s112_s1 = inlined_call_operand.vmem [shape: f32[1,32], index: 1, kind: output, shape index: {}]  }
   0x1   :  { %v53_v0 = vld [vmem:[%s111_s0 + $0x7] sm:$0x1]   ;;  %v55_v1 = vld [vmem:[%s111_s0 + $0x5] sm:$0x1]   ;;  %v57_v2 = vld [vmem:[%s111_s0 + $0x3] sm:$0x1]  }
   0x2   :  { %7 = vrot.lane.b32.xlu0 %v53_v0, %s67_s10  ;;  %19 = vrot.lane.b32.xlu1 %v55_v1, %s68_s11  ;;  %s69_s14 = smov 12   ;;  %v54_v3 = vld [vmem:[%s111_s0 + $0x6] sm:$0x1]   ;;  %v56_v4 = vld [vmem:[%s111_s0 + $0x4] sm:$0x1]   ;;  %s70_s21 = smov 24  }
   0x3   :  { %31 = vrot.lane.b32.xlu2 %v57_v2, %s69_s14  ;;  %v58_v5 = vld [vmem:[%s111_s0 + $0x2] sm:$0x1]   ;;  %s71_s22 = smov 16   ;;  %s72_s23 = smov 8   ;;  %v59_v6 = vld [vmem:[%s111_s0 + $0x1] sm:$0x1]  }
   0x4   :  { %s73_s26 = smov 4   ;;  %v2_v7 = vld [vmem:[%s111_s0] sm:$0x1]   ;;  %vm27_vm4 = vcmask 162944   ;;  %vm33_vm5 = vcmask 130144   ;;  %vm39_vm6 = vcmask 97344  }
   0x5   :  { %4 = vst.msk [vmem:[#allocation0] sm:$0x1] %vm3_vm0, %v2_v7   ;;  %vm45_vm7 = vcmask 64544  }
   0xa   :  { %13 = vrot.lane.b32.xlu0 %v54_v3, %s70_s21  ;;  %25 = vrot.lane.b32.xlu1 %v56_v4, %s71_s22 }
   0xb   :  { %37 = vrot.lane.b32.xlu2 %v58_v5, %s72_s23 }
  0x12   :  { %43 = vrot.lane.b32.xlu0 %v59_v6, %s73_s26 }
  0x5d   :  { %v32_v8 = vpop.permute.xlu2 %31  }
  0x65   :  { %v38_v9 = vpop.permute.xlu2 %37  }
  0x74   :  { %v8_v10 = vpop.permute.xlu0 %7   ;;  %v20_v11 = vpop.permute.xlu1 %19  }
  0x75   :  { %10 = vst.msk [vmem:[#allocation0] sm:$0x1] %vm9_vm1, %v8_v10  }
  0x7c   :  { %v14_v12 = vpop.permute.xlu0 %13   ;;  %v26_v13 = vpop.permute.xlu1 %25  }
  0x7d   :  { %16 = vst.msk [vmem:[#allocation0] sm:$0x1] %vm15_vm2, %v14_v12  }
  0x7e   :  { %22 = vst.msk [vmem:[#allocation0] sm:$0x1] %vm21_vm3, %v20_v11  }
  0x7f   :  { %28 = vst.msk [vmem:[#allocation0] sm:$0x1] %vm27_vm4, %v26_v13  }
  0x80   :  { %34 = vst.msk [vmem:[#allocation0] sm:$0x1] %vm33_vm5, %v32_v8  }
  0x81   :  { %40 = vst.msk [vmem:[#allocation0] sm:$0x1] %vm39_vm6, %v38_v9  }
  0x84   :  { %v44_v14 = vpop.permute.xlu0 %43  }
  0x85   :  { %46 = vst.msk [vmem:[#allocation0] sm:$0x1] %vm45_vm7, %v44_v14  }
  0x8c   :  { %v49_v15 = vld [vmem:[#allocation0] sm:$0x1] }
  0x8d   :  { %52 = vst [vmem:[%s112_s1] sm:$0x1] %v49_v15 }

// kernel: cae_forward.1
= control target key start
LH: loop header
LB: loop body
LE: loop exit
PB: predicated region body
PF: predicated region fallthrough
CT: control target
= control target key end

     0   :  { %17 = vsyncpa [#allocation3], 0  ;;  %s919_s17 = smov 0   ;;  %s1177_s0 = inlined_call_operand.vmem [shape: f32[2], index: 0, kind: input, shape index: {}]   ;;  %s1178_s1 = inlined_call_operand.vmem [shape: f32[2,16,48], index: 1, kind: input, shape index: {}]   ;;  %s1179_s2 = inlined_call_operand.vmem [shape: f32[48,64], index: 2, kind: input, shape index: {}]   ;;  %s1180_s3 = inlined_call_operand.vmem [shape: f32[1,64], index: 3, kind: input, shape index: {}]   ;;  %s1181_s4 = inlined_call_operand.vmem [shape: f32[192,64], index: 4, kind: input, shape index: {}]   ;;  %s1182_s5 = inlined_call_operand.vmem [shape: f32[1,64], index: 5, kind: input, shape index: {}]   ;;  %s1183_s6 = inlined_call_operand.vmem [shape: f32[192,32], index: 6, kind: input, shape index: {}]   ;;  %s1184_s7 = inlined_call_operand.vmem [shape: f32[1,32], index: 7, kind: input, shape index: {}]   ;;  %s1185_s8 = inlined_call_operand.vmem [shape: f32[96,32], index: 8, kind: input, shape index: {}]   ;;  %s1186_s9 = inlined_call_operand.vmem [shape: f32[1,32], index: 9, kind: input, shape index: {}]   ;;  %s1187_s10 = inlined_call_operand.vmem [shape: f32[2,8,64], index: 10, kind: output, shape index: {0}]   ;;  %s1188_s11 = inlined_call_operand.vmem [shape: f32[2,8,32], index: 11, kind: output, shape index: {1}]  }
   0x1 LB: > { %s784_s18 = sadd.s32 4294967295, %s854_s17   ;;  %p786_p0 = scmp.ge.s32.totalorder %s854_s17, 1  ;;  %s854_s17 = sphi %s919_s17, %s23_s17  }
   0x2   : > { %p295_p1 = scmp.lt.s32.totalorder %s854_s17, 3  ;;  %s307_s21 = sshll.u32 %s1177_s0, 4  ;;  %s308_s21 = int_to_ptr.vmem [resolvable:$true] %s307_s21 }
   0x3   : > { %p812_p3 = scmp.eq.s32.totalorder %s784_s18, 0  ;;  %s856_s22 = smov [#allocation2]  }
   0x4   : > { %p296_p2 = pnand %p786_p0, %p295_p1 }
   0x6   : > { %p808_p4 = pneg %p296_p2  ;;  %352 = sbr.rel (%p296_p2) target bundleno = 925 (0x39d), region = 60 }
   0x8   : > { %p809_p5 = pnand %p812_p3, %p808_p4 }
   0xa   : > { %811 = dma.vmem_to_smem (!%p809_p5), %s308_s21, 16, %s856_s22, [#allocation3]  }
   0xb   : > { %849 = dma.done.wait (%p812_p3), [#allocation3], 16  }
   0xc   : > { %851 = vsyncadd (%p812_p3), [#allocation3], 4294967280 }
   0xd   : > { %359 = sfence }
   0xe   : > { %v419_v0 = vld [vmem:[%s1179_s2 + $0x28] sm:$0xff]  ;;  %v418_v1 = vld [vmem:[%s1179_s2 + $0x20] sm:$0xff]  ;;  %p397_p6 = scmp.lt.s32.totalorder %s784_s18, 1  ;;  %v417_v2 = vld [vmem:[%s1179_s2 + $0x18] sm:$0xff]  ;;  %vm424_vm0 = vcmask 392192   ;;  %s996_s14 = sld [smem:[#allocation2]] }
   0xf   : > { %441 = vmatpush.msra.mxu0 %v419_v0  ;;  %v495_v3 = vld [vmem:[%s1181_s4 + $0xb8] sm:$0xff]  ;;  %v494_v4 = vld [vmem:[%s1181_s4 + $0xb0] sm:$0xff]  ;;  %v493_v6 = vld [vmem:[%s1181_s4 + $0xa8] sm:$0xff]  ;;  %vm470_vm2 = vcmask 523264   ;;  %s857_s20 = smov 64   ;;  %vm464_vm4 = vcmask 1040384  }
  0x10   : > { %s1190_s18 = smov (!%p397_p6, %s784_s18), 1  ;;  %530 = vmatpush.msra.mxu2 %v495_v3  ;;  %v416_v5 = vld [vmem:[%s1179_s2 + $0x10] sm:$0xff]  ;;  %v415_v7 = vld [vmem:[%s1179_s2 + $0x8] sm:$0xff]  ;;  %v492_v8 = vld [vmem:[%s1181_s4 + $0xa0] sm:$0xff]  ;;  %vm549_vm5 = vcmask 1046528   ;;  %s795_s26 = sld [smem:[#allocation2 + $0x1]] }
  0x11   : > { %442 = vmatpush.msra.mxu0 %v418_v1  ;;  %s803_s16 = sshll.u32 %s1190_s18, 4  ;;  %v414_v9 = vld [vmem:[%s1179_s2] sm:$0xff]  ;;  %v491_v10 = vld [vmem:[%s1181_s4 + $0x98] sm:$0xff]  ;;  %v490_v13 = vld [vmem:[%s1181_s4 + $0x90] sm:$0xff]  ;;  %s858_s12 = smov 32   ;;  %vm644_vm7 = vcmask 261120  }
  0x12   : > { %531 = vmatpush.msra.mxu2 %v494_v4  ;;  %s401_s25 = scalar_lea.vmem %s1178_s1, %s803_s16  ;;  %v489_v14 = vld [vmem:[%s1181_s4 + $0x88] sm:$0xff]  ;;  %v488_v15 = vld [vmem:[%s1181_s4 + $0x80] sm:$0xff]  ;;  %v487_v16 = vld [vmem:[%s1181_s4 + $0x78] sm:$0xff]  ;;  %s793_s16 = sshll.u32 %s1190_s18, 3  ;;  %vm663_vm8 = vcmask 785408  }
  0x13   : > { %443 = vmatpush.msra.mxu0 %v417_v2  ;;  %v412_v11 = vld [vmem:[%s401_s25] sm:$0xff]  ;;  %v413_v12 = vld [vmem:[%s401_s25 + $0x8] sm:$0xff]  ;;  %v486_v17 = vld [vmem:[%s1181_s4 + $0x70] sm:$0xff]  ;;  %502 = vmatpush.msra.mxu1 %v487_v16  ;;  %s405_s24 = scalar_lea.vmem %s1187_s10, %s793_s16  ;;  %s409_s30 = scalar_lea.vmem %s1188_s11, %s793_s16 }
  0x14   : > { %532 = vmatpush.msra.mxu2 %v493_v6  ;;  %v485_v18 = vld [vmem:[%s1181_s4 + $0x68] sm:$0xff]  ;;  %v484_v19 = vld [vmem:[%s1181_s4 + $0x60] sm:$0xff]  ;;  %v483_v20 = vld [vmem:[%s1181_s4 + $0x58] sm:$0xff]  ;;  %v456_v28 = vstv %s996_s14 }
  0x15   : > { %444 = vmatpush.msra.mxu0 %v416_v5  ;;  %503 = vmatpush.msra.mxu1 %v486_v17  ;;  %v482_v21 = vld [vmem:[%s1181_s4 + $0x50] sm:$0xff]  ;;  %v481_v22 = vld [vmem:[%s1181_s4 + $0x48] sm:$0xff]  ;;  %v480_v23 = vld [vmem:[%s1181_s4 + $0x40] sm:$0xff] }
  0x16   : > { %533 = vmatpush.msra.mxu2 %v492_v8  ;;  %v479_v24 = vld [vmem:[%s1181_s4 + $0x38] sm:$0xff]  ;;  %v825_v25 = vld [vmem:[%s1180_s3] ss:$0 sm:$0xff]  ;;  %v478_v26 = vld [vmem:[%s1181_s4 + $0x30] sm:$0xff] }
  0x17   : > { %445 = vmatpush.msra.mxu0 %v415_v7  ;;  %504 = vmatpush.msra.mxu1 %v485_v18  ;;  %v477_v29 = vld [vmem:[%s1181_s4 + $0x28] sm:$0xff]  ;;  %v476_v31 = vld [vmem:[%s1181_s4 + $0x20] sm:$0xff]  ;;  %v475_v33 = vld [vmem:[%s1181_s4 + $0x18] sm:$0xff] }
  0x18   : > { %534 = vmatpush.msra.mxu2 %v491_v10  ;;  %v474_v35 = vld [vmem:[%s1181_s4 + $0x10] sm:$0xff]  ;;  %v473_v37 = vld [vmem:[%s1181_s4 + $0x8] sm:$0xff]  ;;  %v472_v41 = vld [vmem:[%s1181_s4] sm:$0xff] }
  0x19   : > { %446 = vmatpush.msra.mxu0 %v414_v9  ;;  %505 = vmatpush.msra.mxu1 %v484_v19  ;;  %v578_v42 = vld [vmem:[%s1183_s6 + $0xb8] sm:$0xff]  ;;  %v577_v43 = vld [vmem:[%s1183_s6 + $0xb0] sm:$0xff]  ;;  %v576_v44 = vld [vmem:[%s1183_s6 + $0xa8] sm:$0xff] }
  0x1a   : > { %796 = vmatmul.msk.f32.vlgmr.msra.gmra.mxu0 %vm424_vm0, %v412_v11  ;;  %535 = vmatpush.msra.mxu2 %v490_v13  ;;  %v575_v45 = vld [vmem:[%s1183_s6 + $0xa0] sm:$0xff]  ;;  %v574_v50 = vld [vmem:[%s1183_s6 + $0x98] sm:$0xff]  ;;  %v573_v51 = vld [vmem:[%s1183_s6 + $0x90] sm:$0xff] }
  0x1b   : > { %506 = vmatpush.msra.mxu1 %v483_v20  ;;  %614 = vmatpush.msrb.mxu0 %v578_v42  ;;  %v572_v52 = vld [vmem:[%s1183_s6 + $0x88] sm:$0xff]  ;;  %v571_v53 = vld [vmem:[%s1183_s6 + $0x80] sm:$0xff]  ;;  %v570_v54 = vld [vmem:[%s1183_s6 + $0x78] sm:$0xff] }
  0x1c   : > { %536 = vmatpush.msra.mxu2 %v489_v14  ;;  %v569_v55 = vld [vmem:[%s1183_s6 + $0x70] sm:$0xff]  ;;  %586 = vmatpush.msra.mxu3 %v570_v54  ;;  %v568_v56 = vld [vmem:[%s1183_s6 + $0x68] sm:$0xff]  ;;  %v567_v57 = vld [vmem:[%s1183_s6 + $0x60] sm:$0xff] }
  0x1d   : > { %507 = vmatpush.msra.mxu1 %v482_v21  ;;  %615 = vmatpush.msrb.mxu0 %v577_v43  ;;  %v566_v58 = vld [vmem:[%s1183_s6 + $0x58] sm:$0xff]  ;;  %v565_v59 = vld [vmem:[%s1183_s6 + $0x50] sm:$0xff]  ;;  %v564_v60 = vld [vmem:[%s1183_s6 + $0x48] sm:$0xff] }
  0x1e   : > { %537 = vmatpush.msra.mxu2 %v488_v15  ;;  %587 = vmatpush.msra.mxu3 %v569_v55  ;;  %v563_v61 = vld [vmem:[%s1183_s6 + $0x40] sm:$0xff]  ;;  %v562_v62 = vld [vmem:[%s1183_s6 + $0x38] sm:$0xff]  ;;  %v561_v63 = vld [vmem:[%s1183_s6 + $0x30] sm:$0xff] }
  0x1f   : > { %508 = vmatpush.msra.mxu1 %v481_v22  ;;  %616 = vmatpush.msrb.mxu0 %v576_v44  ;;  %v560_v0 = vld [vmem:[%s1183_s6 + $0x28] sm:$0xff]  ;;  %v559_v1 = vld [vmem:[%s1183_s6 + $0x20] sm:$0xff]  ;;  %v558_v3 = vld [vmem:[%s1183_s6 + $0x18] sm:$0xff] }
  0x20   : > { %588 = vmatpush.msra.mxu3 %v568_v56  ;;  %v826_v2 = vld [vmem:[%s1182_s5] ss:$0 sm:$0xff]  ;;  %v557_v5 = vld [vmem:[%s1183_s6 + $0x10] sm:$0xff]  ;;  %v556_v8 = vld [vmem:[%s1183_s6 + $0x8] sm:$0xff] }
  0x21   : > { %509 = vmatpush.msra.mxu1 %v480_v23  ;;  %617 = vmatpush.msrb.mxu0 %v575_v45  ;;  %v658_v17 = vld [vmem:[%s1185_s8 + $0x58] sm:$0xff]  ;;  %v657_v18 = vld [vmem:[%s1185_s8 + $0x50] sm:$0xff]  ;;  %v656_v19 = vld [vmem:[%s1185_s8 + $0x48] sm:$0xff] }
  0x22   : > { %797 = vmatmul.msk.f32.gmra.mxu0 %vm424_vm0, %v413_v12  ;;  %589 = vmatpush.msra.mxu3 %v567_v57  ;;  %v555_v12 = vld [vmem:[%s1183_s6] sm:$0xff]  ;;  %v654_v21 = vld [vmem:[%s1185_s8 + $0x38] sm:$0xff]  ;;  %v653_v22 = vld [vmem:[%s1185_s8 + $0x30] sm:$0xff] }
  0x23   : > { %510 = vmatpush.msra.mxu1 %v479_v24  ;;  %618 = vmatpush.msrb.mxu0 %v574_v50  ;;  %v655_v20 = vld [vmem:[%s1185_s8 + $0x40] sm:$0xff]  ;;  %v652_v23 = vld [vmem:[%s1185_s8 + $0x28] sm:$0xff] }
  0x24   : > { %590 = vmatpush.msra.mxu3 %v566_v58  ;;  %671 = vmatpush.msrb.mxu2 %v658_v17  ;;  %v827_v24 = vld [vmem:[%s1184_s7] ss:$0 sm:$0xff] }
  0x25   : > { %511 = vmatpush.msra.mxu1 %v478_v26  ;;  %619 = vmatpush.msrb.mxu0 %v573_v51  ;;  %v828_v45 = vld [vmem:[%s1186_s9] ss:$0 sm:$0xff] }
  0x26   : > { %591 = vmatpush.msra.mxu3 %v565_v59  ;;  %672 = vmatpush.msrb.mxu2 %v657_v18 }
  0x27   : > { %512 = vmatpush.msra.mxu1 %v477_v29  ;;  %620 = vmatpush.msrb.mxu0 %v572_v52 }
  0x28   : > { %592 = vmatpush.msra.mxu3 %v564_v60  ;;  %673 = vmatpush.msrb.mxu2 %v656_v19 }
  0x29   : > { %513 = vmatpush.msra.mxu1 %v476_v31  ;;  %621 = vmatpush.msrb.mxu0 %v571_v53 }
  0x2a   : > { %593 = vmatpush.msra.mxu3 %v563_v61  ;;  %674 = vmatpush.msrb.mxu2 %v655_v20 }
  0x2b   : > { %514 = vmatpush.msra.mxu1 %v475_v33 }
  0x2c   : > { %594 = vmatpush.msra.mxu3 %v562_v62  ;;  %675 = vmatpush.msrb.mxu2 %v654_v21 }
  0x2d   : > { %515 = vmatpush.msra.mxu1 %v474_v35  ;;  %v650_v35 = vld [vmem:[%s1185_s8 + $0x18] sm:$0xff] }
  0x2e   : > { %595 = vmatpush.msra.mxu3 %v561_v63  ;;  %676 = vmatpush.msrb.mxu2 %v653_v22 }
  0x2f   : > { %516 = vmatpush.msra.mxu1 %v473_v37  ;;  %v648_v37 = vld [vmem:[%s1185_s8 + $0x8] sm:$0xff] }
  0x30   : > { %596 = vmatpush.msra.mxu3 %v560_v0  ;;  %677 = vmatpush.msrb.mxu2 %v652_v23 }
  0x31   : > { %517 = vmatpush.msra.mxu1 %v472_v41 }
  0x32   : > { %597 = vmatpush.msra.mxu3 %v559_v1 }
  0x34   : > { %598 = vmatpush.msra.mxu3 %v558_v3 }
  0x36   : > { %599 = vmatpush.msra.mxu3 %v557_v5 }
  0x38   : > { %600 = vmatpush.msra.mxu3 %v556_v8 }
  0x3a   : > { %601 = vmatpush.msra.mxu3 %v555_v12 }
  0x97   : > { %v448_v27 = vpop.f32.mrf.mxu0 }
  0x98   : > { %v449_v30 = vadd.f32 %v825_v25, %v448_v27 }
  0x9a   : > { %v457_v32 = vmul.f32 %v456_v28, %v449_v30  ;;  %vm454_vm1 = vcmp.gt.f32.partialorder %v449_v30, 0.0 }
  0x9c   : > { %v459_v34 = vsel %vm454_vm1, %v449_v30, %v457_v32 }
  0x9d   : > { %798 = vmatmul.msk.f32.vlgmr.msra.gmra.mxu2 %vm470_vm2, %v459_v34  ;;  %v462_v46 = vrot.slane %v459_v34, 7  ;;  %v651_v34 = vld [vmem:[%s1185_s8 + $0x20] sm:$0xff] }
  0x9e   : > { %678 = vmatpush.msrb.mxu2 %v651_v34 }
  0x9f   : > { %v451_v36 = vpop.f32.mrf.mxu0  ;;  %v465_v48 = vsel %vm464_vm4, 0.0, %v462_v46 }
  0xa0   : > { %v452_v38 = vadd.f32 %v825_v25, %v451_v36  ;;  %v649_v36 = vld [vmem:[%s1185_s8 + $0x10] sm:$0xff]  ;;  %679 = vmatpush.msrb.mxu2 %v650_v35 }
  0xa2   : > { %vm455_vm3 = vcmp.gt.f32.partialorder %v452_v38, 0.0  ;;  %v458_v39 = vmul.f32 %v456_v28, %v452_v38  ;;  %v627_v28 = vstv %s795_s26  ;;  %680 = vmatpush.msrb.mxu2 %v649_v36 }
  0xa4   : > { %v460_v40 = vsel %vm455_vm3, %v452_v38, %v458_v39  ;;  %681 = vmatpush.msrb.mxu2 %v648_v37  ;;  %v647_v38 = vld [vmem:[%s1185_s8] sm:$0xff] }
  0xa5   : > { %467 = vrot.lane.b32.xlu0 %v460_v40, %s857_s20 }
  0xa6   : > { %682 = vmatpush.msrb.mxu2 %v647_v38 }
 0x117   : > { %v468_v47 = vpop.permute.xlu0 %467 }
 0x118   : > { %v471_v49 = vsel %vm470_vm2, %v465_v48, %v468_v47 }
 0x119   : > { %518 = vmatmul.f32.vlgmr.msra.gmra.mxu1 %v471_v49 }
 0x120   : > { %v539_v7 = vpop.f32.mrf.mxu2 }
 0x196   : > { %v519_v4 = vpop.f32.mrf.mxu1 }
 0x197   : > { %v520_v6 = vadd.f32 %v826_v2, %v519_v4 }
 0x199   : > { %v540_v9 = vadd.f32 %v539_v7, %v520_v6 }
 0x19b   : > { %542 = vst.msk [vmem:[%s405_s24] sm:$0xff] %vm470_vm2, %v540_v9  ;;  %551 = vrot.lane.b32.xlu0 %v540_v9, %s857_s20  ;;  %v547_v10 = vrot.slane %v540_v9, 1  ;;  %v544_v13 = vrot.slane %v540_v9, 7 }
 0x19d   : > { %v550_v11 = vsel %vm549_vm5, %v547_v10, 0.0  ;;  %v546_v15 = vsel %vm464_vm4, 0.0, %v544_v13 }
 0x19e   : > { %799 = vmatmul.msk.f32.vlgmr.msrb.gmra.mxu0 %vm470_vm2, %v550_v11 }
 0x20d   : > { %v552_v14 = vpop.permute.xlu0 %551 }
 0x20e   : > { %v554_v16 = vsel %vm470_vm2, %v546_v15, %v552_v14 }
 0x20f   : > { %602 = vmatmul.f32.vlgmr.msra.gmra.mxu3 %v554_v16 }
 0x21b   : > { %v623_v27 = vpop.f32.mrf.mxu0 }
 0x292   : > { %v603_v25 = vpop.f32.mrf.mxu3 }
 0x293   : > { %v604_v26 = vadd.f32 %v827_v24, %v603_v25 }
 0x295   : > { %v624_v29 = vadd.f32 %v623_v27, %v604_v26 }
 0x297   : > { %vm626_vm6 = vcmp.gt.f32.partialorder %v624_v29, 0.0  ;;  %v628_v30 = vmul.f32 %v627_v28, %v624_v29 }
 0x299   : > { %v629_v31 = vsel %vm626_vm6, %v624_v29, %v628_v30 }
 0x29a   : > { %637 = vrot.lane.b32.xlu1 %v629_v31, %s858_s12  ;;  %v634_v32 = vrot.slane %v629_v31, 1  ;;  %v631_v40 = vrot.slane %v629_v31, 7 }
 0x29c   : > { %v636_v33 = vsel %vm549_vm5, %v634_v32, 0.0  ;;  %v633_v41 = vsel %vm464_vm4, 0.0, %v631_v40 }
 0x2a2   : > { %641 = vrot.lane.b32.xlu1 %v636_v33, %s857_s20 }
 0x30c   : > { %v638_v39 = vpop.permute.xlu1 %637 }
 0x30d   : > { %v645_v42 = vsel %vm644_vm7, %v633_v41, %v638_v39 }
 0x314   : > { %v642_v43 = vpop.permute.xlu1 %641 }
 0x315   : > { %v646_v44 = vsel %vm470_vm2, %v645_v42, %v642_v43 }
 0x316   : > { %800 = vmatmul.msk.f32.vlgmr.msrb.gmra.mxu2 %vm663_vm8, %v646_v44 }
 0x399   : > { %v684_v46 = vpop.f32.mrf.mxu2 }
 0x39a   : > { %v685_v47 = vadd.f32 %v828_v45, %v684_v46 }
 0x39c   : > { %687 = vst.msk [vmem:[%s409_s30] sm:$0xff] %vm644_vm7, %v685_v47 }
 0x39d PF: > { %s23_s17 = sadd.s32 1, %s854_s17  }
 0x39e   : > { %p20_p7 = scmp.ge.s32.totalorder %s23_s17, 4  }
 0x3a0   :  { %22 = sbr.rel (!%p20_p7) target bundleno = 1 (0x1), region = 107 }
 0x3a5   :  { %721 = vsyncpa [#allocation3], 1 }
 0x3a6   :  { %723 = vsyncpa [#allocation3 + $0x1], 1 }

</bundles_post_ra>
